<compile_context>
chip_gen: v7x
topology: tpu7x:2x2x1
jax: 0.10.0
libtpu: 0.0.40
codegen_flags: <defaults>
</compile_context>

<pallas_src>
import math

import jax
import jax.numpy as jnp
from jax.experimental import pallas as pl
from jax.experimental.pallas import tpu as pltpu


def crossnet_kernel(x_ref, m_ref, b_ref, o_ref):
    # x_ref : (TB, W)    packed (and feature-padded) input tile
    # m_ref : (L, W, W)  per-layer block-diagonal reduce+broadcast matrices
    # b_ref : (L, W)     per-layer packed biases
    # o_ref : (TB, W)    output tile
    xl = x_ref[...].astype(jnp.float32)
    num_layers = m_ref.shape[0]
    for i in range(num_layers):  # layer_num is small & static -> unrolled
        # Block-diagonal MXU matmul: for every packed sample segment it both
        # reduces <x_l, w_i> and broadcasts the scalar back across that
        # segment, so s is lane-dense (TB, W); no cross-lane op, no masked
        # stores.  f32 operands kept for the 1e-4 tolerance.
        s = jnp.dot(xl, m_ref[i].astype(jnp.float32),
                    preferred_element_type=jnp.float32)
        # Reload x0 per layer instead of keeping a tile-sized copy live across
        # the unrolled loop (VMEM loads are ~free; cuts live VMEM/vreg use).
        x0 = x_ref[...].astype(jnp.float32)
        xl = x0 * s + b_ref[i, :].astype(jnp.float32)[None, :] + xl
    o_ref[...] = xl.astype(o_ref.dtype)


def _round_up(x, m):
    return -(-x // m) * m


def _chip_info():
    """(vmem_limit_bytes, mxu_width, multi_tensorcore) for the local chip."""
    vmem_cap = 64 * 1024 * 1024            # conservative floor (v7x per-core)
    try:
        vmem_cap = int(pltpu.get_tpu_info().vmem_capacity_bytes)
    except Exception:
        pass
    kind = ""
    try:
        kind = jax.devices()[0].device_kind.lower()
    except Exception:
        pass
    # v6e / v7x have a 256-wide MXU; v7x has two TensorCores per chip.
    wide_mxu = any(t in kind for t in ("v6", "v7", "trillium"))
    multi_tc = "v7" in kind
    mxu_width = 256 if wide_mxu else 128
    vmem_limit = vmem_cap * 3 // 4          # headroom for compiler scratch
    return vmem_limit, mxu_width, multi_tc


def _packing(F, mxu_width):
    """Padded feature width F_pad and packing factor k (row width W = k*F_pad).

    * F <= mxu_width : pad F to the smallest divisor of mxu_width >= F and pack
      k = mxu_width // F_pad samples per row -> each row is exactly one MXU
      width, all loads/stores lane-dense and unmasked.
    * F >  mxu_width : pad F to a multiple of 128, k = 1; the per-layer matrix
      is column-replicated so the matmul output is still (TB, F_pad).
    """
    if F <= mxu_width:
        F_pad = F
        while mxu_width % F_pad != 0:
            F_pad += 1
        k = mxu_width // F_pad
    else:
        F_pad = _round_up(F, 128)
        k = 1
    return F_pad, k


def crossnet_forward(x, kernels, bias):
    """x: (B, F); kernels, bias: (L, F, 1) or (L, F).  Returns (B, F)."""
    B, F = x.shape
    L = kernels.shape[0]
    kern = kernels.reshape(L, F).astype(jnp.float32)
    bia = bias.reshape(L, F).astype(jnp.float32)

    vmem_limit, mxu_width, multi_tc = _chip_info()
    itemsize = jnp.dtype(x.dtype).itemsize

    # ---- lane-dense packing (pad F, pack k samples per row) -----------------
    F_pad, k = _packing(F, mxu_width)
    W = k * F_pad

    if F_pad != F:
        # Zero padding is exact: padded lanes have w=0, b=0, x0=0, so x_l stays
        # identically 0 there across all layers and is sliced off at the end.
        kern = jnp.pad(kern, ((0, 0), (0, F_pad - F)))
        bia = jnp.pad(bia, ((0, 0), (0, F_pad - F)))
        x = jnp.pad(x, ((0, 0), (0, F_pad - F)))

    # M[l, a*F_pad+p, b*F_pad+q] = w_l[p] if a == b else 0
    # (kron(eye(k), column-replicated w) -> one MXU matmul does the per-sample
    #  dot product AND the broadcast back across that sample's lanes).
    blocks = jnp.broadcast_to(kern[:, :, None], (L, F_pad, F_pad))
    eye_k = jnp.eye(k, dtype=jnp.float32)
    m = jnp.einsum('ab,lpq->lapbq', eye_k, blocks).reshape(L, W, W)
    b_packed = jnp.tile(bia, (1, k))                       # (L, W)

    # pad batch to a multiple of k and pack k samples per row (free reshape)
    rows = -(-B // k)
    pad_samples = rows * k - B
    x_p = jnp.pad(x, ((0, pad_samples), (0, 0))) if pad_samples else x
    x_p = x_p.reshape(rows, W)

    # ---- batch-tile selection ------------------------------------------------
    # >=512-row tiles already reach ~85% of the HBM roofline, so cap the tile
    # instead of filling VMEM; include the kernel's three tile-sized f32
    # temporaries (x0, xl, s) plus double-buffered in/out tiles in the budget.
    TILE_CAP = 1024
    bytes_per_row = (2 + 2) * W * itemsize + 3 * W * 4
    weight_bytes = 2 * 4 * (int(m.size) + int(b_packed.size))
    budget = vmem_limit * 3 // 4
    avail = max(budget - weight_bytes, 8 * bytes_per_row)
    tb = max(8, (avail // bytes_per_row) // 8 * 8)
    tb = min(tb, TILE_CAP)

    rows_needed = _round_up(rows, 8)
    if tb >= rows_needed:
        tb = rows_needed
        if multi_tc and rows_needed >= 16:
            # split into >=2 balanced tiles only where a 2nd TensorCore exists
            tb = max(8, _round_up(rows_needed // 2, 8))
    grid_rows = _round_up(rows, tb)
    if grid_rows > rows:
        x_p = jnp.pad(x_p, ((0, grid_rows - rows), (0, 0)))
    num_tiles = grid_rows // tb

    # ---- cost estimate (memory-bound custom call) ----------------------------
    cost = pl.CostEstimate(
        flops=int(2 * L * grid_rows * W * W + 3 * L * grid_rows * W),
        transcendentals=0,
        bytes_accessed=int(itemsize * 2 * grid_rows * W
                           + 4 * (int(m.size) + int(b_packed.size))),
    )

    out_p = pl.pallas_call(
        crossnet_kernel,
        out_shape=jax.ShapeDtypeStruct((grid_rows, W), x.dtype),
        grid_spec=pltpu.PrefetchScalarGridSpec(
            num_scalar_prefetch=0,
            grid=(num_tiles,),
            in_specs=[
                pl.BlockSpec((tb, W), lambda i: (i, 0)),         # x tile
                pl.BlockSpec(m.shape, lambda i: (0, 0, 0)),      # weights (resident)
                pl.BlockSpec(b_packed.shape, lambda i: (0, 0)),  # biases (resident)
            ],
            out_specs=pl.BlockSpec((tb, W), lambda i: (i, 0)),
        ),
        compiler_params=pltpu.CompilerParams(
            dimension_semantics=("parallel",),
            vmem_limit_bytes=int(vmem_limit),
        ),
        cost_estimate=cost,
    )(x_p, m, b_packed)

    # unpack rows back to samples, drop batch + feature padding
    return out_p.reshape(grid_rows * k, F_pad)[:B, :F]


def crossnet_reference(x, kernels, bias):
    """Pure-JAX reference mirroring the PyTorch forward exactly."""
    L, F = kernels.shape[0], x.shape[1]
    kern = kernels.reshape(L, F)
    bia = bias.reshape(L, F)
    x0 = x[:, :, None]                                            # (B, F, 1)
    xl = x0
    for i in range(L):
        xl_w = jnp.einsum('bfi,f->bi', xl, kern[i])[:, :, None]   # (B, 1, 1)
        dot_ = jnp.matmul(x0, xl_w)                               # (B, F, 1)
        xl = dot_ + bia[i][None, :, None] + xl
    return jnp.squeeze(xl, axis=2)


if __name__ == "__main__":
    LAYER_NUM = 2

    def make_params(F, key):
        # nn.init.xavier_normal_ on each (F, 1) kernel slice:
        # std = sqrt(2 / (fan_in + fan_out)) = sqrt(2 / (F + 1)); bias zeros.
        std = math.sqrt(2.0 / (F + 1))
        kernels = std * jax.random.normal(key, (LAYER_NUM, F, 1), dtype=jnp.float32)
        bias = jnp.zeros((LAYER_NUM, F, 1), dtype=jnp.float32)
        return kernels, bias

    key = jax.random.PRNGKey(0)
    # case 1: F divides the MXU width            -> pure packed path
    # case 2: F does not divide it (48 -> 64)    -> feature-padded packed path
    # case 3: F > 128                            -> column-replicated / k=1 path
    for (B, F) in [(8, 32), (5, 48), (4, 160)]:
        key, kx, kw = jax.random.split(key, 3)
        x = jax.random.normal(kx, (B, F), dtype=jnp.float32)
        kernels, bias = make_params(F, kw)

        out = crossnet_forward(x, kernels, bias)
        jax.block_until_ready(out)

        ref = crossnet_reference(x, kernels, bias)
        assert out.shape == (B, F)
        assert jnp.allclose(out, ref, atol=1e-4, rtol=1e-4), \
            f"mismatch vs reference for (B={B}, F={F})"

    print("KERNEL_OK")
</pallas_src>

<mosaic_0001>
module attributes {stable_mosaic.version = 11 : i64} {
  func.func @crossnet_kernel(%arg0: i32, %arg1: memref<8x128xf32, #tpu.memory_space<vmem>>, %arg2: memref<2x128x128xf32, #tpu.memory_space<vmem>>, %arg3: memref<2x128xf32, #tpu.memory_space<vmem>>, %arg4: memref<8x128xf32, #tpu.memory_space<vmem>>) attributes {dimension_semantics = [#tpu.dimension_semantics<parallel>], iteration_bounds = array<i64: 1>, scalar_prefetch = 0 : i64, scratch_operands = 0 : i64, tpu.core_type = #tpu.core_type<tc>, window_params = [{transform_indices = @transform_0, window_bounds = array<i64: 8, 128>}, {pipeline_mode = #tpu.pipeline_mode<synchronous>, transform_indices = @transform_1, window_bounds = array<i64: 2, 128, 128>}, {pipeline_mode = #tpu.pipeline_mode<synchronous>, transform_indices = @transform_2, window_bounds = array<i64: 2, 128>}, {transform_indices = @transform_3, window_bounds = array<i64: 8, 128>}]} {
    %c0 = arith.constant 0 : index
    %c0_0 = arith.constant 0 : index
    %0 = vector.load %arg1[%c0, %c0_0] : memref<8x128xf32, #tpu.memory_space<vmem>>, vector<8x128xf32>
    %c0_1 = arith.constant 0 : index
    %c0_2 = arith.constant 0 : index
    %c0_3 = arith.constant 0 : index
    %1 = vector.load %arg2[%c0_1, %c0_2, %c0_3] : memref<2x128x128xf32, #tpu.memory_space<vmem>>, vector<1x128x128xf32>
    %2 = vector.shape_cast %1 : vector<1x128x128xf32> to vector<128x128xf32>
    %cst = arith.constant dense<0.000000e+00> : vector<8x128xf32>
    %3 = tpu.matmul %0, %2, %cst {dimension_numbers = #tpu.dot_dimension_numbers<[1], [0], [0], [1], [0, 0, 1, 1], [], []>} : vector<8x128xf32>, vector<128x128xf32>, vector<8x128xf32> -> vector<8x128xf32>
    %c0_4 = arith.constant 0 : index
    %c0_5 = arith.constant 0 : index
    %4 = vector.load %arg1[%c0_4, %c0_5] : memref<8x128xf32, #tpu.memory_space<vmem>>, vector<8x128xf32>
    %5 = arith.mulf %4, %3 : vector<8x128xf32>
    %c0_6 = arith.constant 0 : index
    %c0_7 = arith.constant 0 : index
    %6 = vector.load %arg3[%c0_6, %c0_7] : memref<2x128xf32, #tpu.memory_space<vmem>>, vector<1x128xf32>
    %7 = vector.shape_cast %6 : vector<1x128xf32> to vector<128xf32>
    %8 = vector.shape_cast %7 : vector<128xf32> to vector<1x128xf32>
    %9 = vector.broadcast %8 : vector<1x128xf32> to vector<8x128xf32>
    %10 = arith.addf %5, %9 : vector<8x128xf32>
    %11 = arith.addf %10, %0 : vector<8x128xf32>
    %c1 = arith.constant 1 : index
    %c0_8 = arith.constant 0 : index
    %c0_9 = arith.constant 0 : index
    %12 = vector.load %arg2[%c1, %c0_8, %c0_9] : memref<2x128x128xf32, #tpu.memory_space<vmem>>, vector<1x128x128xf32>
    %13 = vector.shape_cast %12 : vector<1x128x128xf32> to vector<128x128xf32>
    %cst_10 = arith.constant dense<0.000000e+00> : vector<8x128xf32>
    %14 = tpu.matmul %11, %13, %cst_10 {dimension_numbers = #tpu.dot_dimension_numbers<[1], [0], [0], [1], [0, 0, 1, 1], [], []>} : vector<8x128xf32>, vector<128x128xf32>, vector<8x128xf32> -> vector<8x128xf32>
    %c0_11 = arith.constant 0 : index
    %c0_12 = arith.constant 0 : index
    %15 = vector.load %arg1[%c0_11, %c0_12] : memref<8x128xf32, #tpu.memory_space<vmem>>, vector<8x128xf32>
    %16 = arith.mulf %15, %14 : vector<8x128xf32>
    %c1_13 = arith.constant 1 : index
    %c0_14 = arith.constant 0 : index
    %17 = vector.load %arg3[%c1_13, %c0_14] : memref<2x128xf32, #tpu.memory_space<vmem>>, vector<1x128xf32>
    %18 = vector.shape_cast %17 : vector<1x128xf32> to vector<128xf32>
    %19 = vector.shape_cast %18 : vector<128xf32> to vector<1x128xf32>
    %20 = vector.broadcast %19 : vector<1x128xf32> to vector<8x128xf32>
    %21 = arith.addf %16, %20 : vector<8x128xf32>
    %22 = arith.addf %21, %11 : vector<8x128xf32>
    %c0_15 = arith.constant 0 : index
    %c0_16 = arith.constant 0 : index
    %23 = vector.load %arg4[%c0_15, %c0_16] : memref<8x128xf32, #tpu.memory_space<vmem>>, vector<8x128xf32>
    tpu.vector_store %arg4[%c0_15, %c0_16], %22 {strides = array<i32>} : memref<8x128xf32, #tpu.memory_space<vmem>>, vector<8x128xf32>,
    return
  }
  func.func @transform_0(%arg0: i32) -> (i32, i32) {
    %c0_i32 = arith.constant 0 : i32
    %c0_i32_0 = arith.constant 0 : i32
    return %arg0, %c0_i32 : i32, i32
  }
  func.func @transform_1(%arg0: i32) -> (i32, i32, i32) {
    %c0_i32 = arith.constant 0 : i32
    %c0_i32_0 = arith.constant 0 : i32
    %c0_i32_1 = arith.constant 0 : i32
    %c0_i32_2 = arith.constant 0 : i32
    return %c0_i32, %c0_i32_0, %c0_i32_1 : i32, i32, i32
  }
  func.func @transform_2(%arg0: i32) -> (i32, i32) {
    %c0_i32 = arith.constant 0 : i32
    %c0_i32_0 = arith.constant 0 : i32
    %c0_i32_1 = arith.constant 0 : i32
    return %c0_i32, %c0_i32_0 : i32, i32
  }
  func.func @transform_3(%arg0: i32) -> (i32, i32) {
    %c0_i32 = arith.constant 0 : i32
    %c0_i32_0 = arith.constant 0 : i32
    return %arg0, %c0_i32 : i32, i32
  }
}

</mosaic_0001>

<bundles_post_ra>
// kernel: tpu_custom_call.1
= control target key start
LH: loop header
LB: loop body
LE: loop exit
PB: predicated region body
PF: predicated region fallthrough
CT: control target
= control target key end

     0   :  { %8 = vsyncpa [#allocation3], 0  ;;  %s575_s0 = inlined_call_operand.hbm [shape: f32[8,128], index: 0, kind: input, shape index: {}]   ;;  %s576_s1 = inlined_call_operand.hbm [shape: f32[2,128,128], index: 1, kind: input, shape index: {}]   ;;  %s577_s2 = inlined_call_operand.vmem [shape: f32[2,128], index: 2, kind: input, shape index: {}]   ;;  %s578_s3 = inlined_call_operand.hbm [shape: f32[8,128], index: 3, kind: output, shape index: {}]  }
   0x1   :  { %9 = vsyncpa [#allocation6], 0 }
   0x2   :  { %10 = vsyncpa [#allocation4], 0  ;;  %s482_s12 = smov [#allocation2]   ;;  %s483_s14 = smov [#allocation5]  }
   0x3   :  { %s17_s13 = sshll.u32 %s482_s12, 4  ;;  %s26_s15 = sshll.u32 %s483_s14, 4  ;;  %s18_s13 = int_to_ptr.vmem [resolvable:$true] %s17_s13  ;;  %s510_s15 = int_to_ptr.vmem [resolvable:$true] %s26_s15 }
   0x4   :  { %s410_s18 = scalar_lea.hbm %s575_s0, 128 }
   0x5   :  { %p411_p0 = scmp.ne.s32.totalorder %s575_s0, %s410_s18  ;;  %p414_p1 = scmp.lt.u32.totalorder %s410_s18, %s575_s0 }
   0x7   :  { %p416_p2 = pnand %p414_p1, %p411_p0 }
   0x9   :  { %419 = shalt.err (!%p416_p2)
}
   0xa   :  { %s420_s23 = scalar_lea.vmem %s18_s13, 128  ;;  %p425_p4 = scmp.lt.s32.totalorder %s18_s13, %s18_s13 }
   0xb   :  { %p421_p3 = scmp.ne.s32.totalorder %s18_s13, %s420_s23  ;;  %p426_p5 = scmp.lt.s32.totalorder %s420_s23, %s420_s23 }
   0xd   :  { %p427_p6 = por %p426_p5, %p425_p4 }
   0xf   :  { %p428_p7 = pnand %p427_p6, %p421_p3 }
  0x11   :  { %431 = shalt.err (!%p428_p7)
}
  0x12   :  { %20 = dma.hbm_to_vmem [thread:$0]  %s575_s0, 128, %s18_s13, [#allocation3]  }
  0x13   :  { %s432_s28 = scalar_lea.hbm %s576_s1, 4096 }
  0x14   :  { %p433_p8 = scmp.ne.s32.totalorder %s576_s1, %s432_s28  ;;  %p436_p9 = scmp.lt.u32.totalorder %s432_s28, %s576_s1 }
  0x16   :  { %p438_p10 = pnand %p436_p9, %p433_p8 }
  0x18   :  { %441 = shalt.err (!%p438_p10)
}
  0x19   :  { %s442_s6 = scalar_lea.vmem %s510_s15, 4096  ;;  %p447_p12 = scmp.lt.s32.totalorder %s510_s15, %s510_s15 }
  0x1a   :  { %p443_p11 = scmp.ne.s32.totalorder %s510_s15, %s442_s6  ;;  %p448_p13 = scmp.lt.s32.totalorder %s442_s6, %s442_s6 }
  0x1c   :  { %p449_p0 = por %p448_p13, %p447_p12 }
  0x1e   :  { %p450_p1 = pnand %p449_p0, %p443_p11 }
  0x20   :  { %453 = shalt.err (!%p450_p1)
}
  0x21   :  { %s484_s0 = smov 128   ;;  %s485_s7 = smov 8  }
  0x22   :  { %32 = dma.hbm_to_vmem [thread:$0]  %s576_s1, 4096, %s510_s15, [#allocation6], %s484_s0, %s484_s0, %s485_s7  }
  0x23   :  { %476 = dma.done.wait [#allocation3], 128  }
  0x24   :  { %477 = vsyncadd [#allocation3], 4294967168 }
  0x25   :  { %478 = dma.done.wait [#allocation6], 4096  }
  0x26   :  { %479 = vsyncadd [#allocation6], 4294963200  ;;  %v486_v0 = vmov 0.0|0.0   ;;  %vm487_vm0 = vmmov 0   ;;  %v488_v1 = vmov 0.0   ;;  %v42_v2 = vld [vmem:[#allocation5] sm:$0xff] }
  0x27   :  { %354 = vmatprep.subr.bf16.mxu0 %v486_v0  ;;  %316 = vmatprep.mubr.msk.f32.mxu0 %vm487_vm0, %v488_v1  ;;  %v43_v3 = vld [vmem:[#allocation5 + $0x8] sm:$0xff]  ;;  %v44_v4 = vld [vmem:[#allocation5 + $0x10] sm:$0xff]  ;;  %v45_v6 = vld [vmem:[#allocation5 + $0x18] sm:$0xff]  ;;  %s489_s13 = smov [#allocation7]  }
  0x28   :  { %378 = vmatprep.subr.bf16.mxu1 %v486_v0  ;;  %351 = vmatprep.mubr.msk.f32.mxu1 %vm487_vm0, %v488_v1  ;;  %v355_v5 = vpack.c.bf16 %v43_v3, %v42_v2  ;;  %v358_v7 = vpack.c.bf16 %v45_v6, %v44_v4  ;;  %v46_v8 = vld [vmem:[#allocation5 + $0x20] sm:$0xff]  ;;  %v47_v9 = vld [vmem:[#allocation5 + $0x28] sm:$0xff]  ;;  %v139_v12 = vld [vmem:[#allocation5 + $0x90] sm:$0xff]  ;;  %s238_s14 = sshll.u32 %s489_s13, 4  ;;  %s239_s14 = int_to_ptr.vmem [resolvable:$true] %s238_s14 }
  0x29   :  { %v137_v10 = vld [vmem:[#allocation5 + $0x80] sm:$0xff]  ;;  %v138_v11 = vld [vmem:[#allocation5 + $0x88] sm:$0xff]  ;;  %v140_v13 = vld [vmem:[#allocation5 + $0x98] sm:$0xff]  ;;  %v361_v14 = vpack.c.bf16 %v47_v9, %v46_v8  ;;  %s454_s15 = scalar_lea.vmem %s239_s14, 128  ;;  %p459_p3 = scmp.lt.s32.totalorder %s239_s14, %s239_s14 }
  0x2a   :  { %356 = vmatpush3.bf16.msra.mxu0 %v355_v5  ;;  %v379_v15 = vpack.c.bf16 %v138_v11, %v137_v10  ;;  %v48_v16 = vld [vmem:[#allocation5 + $0x30] sm:$0xff]  ;;  %v49_v17 = vld [vmem:[#allocation5 + $0x38] sm:$0xff]  ;;  %v382_v18 = vpack.c.bf16 %v140_v13, %v139_v12  ;;  %v141_v19 = vld [vmem:[#allocation5 + $0xa0] sm:$0xff]  ;;  %p455_p2 = scmp.ne.s32.totalorder %s239_s14, %s454_s15  ;;  %p460_p4 = scmp.lt.s32.totalorder %s454_s15, %s454_s15 }
  0x2b   :  { %357 = vmatprep.subr.bf16.mxu0 %v486_v0  ;;  %v142_v20 = vld [vmem:[#allocation5 + $0xa8] sm:$0xff]  ;;  %v364_v21 = vpack.c.bf16 %v49_v17, %v48_v16  ;;  %v50_v22 = vld [vmem:[#allocation5 + $0x40] sm:$0xff]  ;;  %v143_v25 = vld [vmem:[#allocation5 + $0xb0] sm:$0xff] }
  0x2c   :  { %380 = vmatpush3.bf16.msra.mxu1 %v379_v15  ;;  %v51_v23 = vld [vmem:[#allocation5 + $0x48] sm:$0xff]  ;;  %v385_v24 = vpack.c.bf16 %v142_v20, %v141_v19  ;;  %v144_v26 = vld [vmem:[#allocation5 + $0xb8] sm:$0xff]  ;;  %v52_v28 = vld [vmem:[#allocation5 + $0x50] sm:$0xff]  ;;  %p461_p5 = por %p460_p4, %p459_p3 }
  0x2d   :  { %381 = vmatprep.subr.bf16.mxu1 %v486_v0  ;;  %v367_v27 = vpack.c.bf16 %v51_v23, %v50_v22  ;;  %v53_v29 = vld [vmem:[#allocation5 + $0x58] sm:$0xff]  ;;  %v388_v30 = vpack.c.bf16 %v144_v26, %v143_v25  ;;  %v145_v31 = vld [vmem:[#allocation5 + $0xc0] sm:$0xff]  ;;  %v146_v32 = vld [vmem:[#allocation5 + $0xc8] sm:$0xff] }
  0x2e   :  { %359 = vmatpush3.bf16.msra.mxu0 %v358_v7  ;;  %v370_v33 = vpack.c.bf16 %v53_v29, %v52_v28  ;;  %v54_v34 = vld [vmem:[#allocation5 + $0x60] sm:$0xff]  ;;  %v55_v35 = vld [vmem:[#allocation5 + $0x68] sm:$0xff]  ;;  %v391_v36 = vpack.c.bf16 %v146_v32, %v145_v31  ;;  %v147_v37 = vld [vmem:[#allocation5 + $0xd0] sm:$0xff]  ;;  %p462_p6 = pnand %p461_p5, %p455_p2 }
  0x2f   :  { %360 = vmatprep.subr.bf16.mxu0 %v486_v0  ;;  %v148_v38 = vld [vmem:[#allocation5 + $0xd8] sm:$0xff]  ;;  %v373_v39 = vpack.c.bf16 %v55_v35, %v54_v34  ;;  %v56_v40 = vld [vmem:[#allocation5 + $0x70] sm:$0xff]  ;;  %v149_v45 = vld [vmem:[#allocation5 + $0xe0] sm:$0xff] }
  0x30   :  { %383 = vmatpush3.bf16.msra.mxu1 %v382_v18  ;;  %v57_v41 = vld [vmem:[#allocation5 + $0x78] sm:$0xff]  ;;  %v394_v42 = vpack.c.bf16 %v148_v38, %v147_v37  ;;  %v150_v46 = vld [vmem:[#allocation5 + $0xe8] sm:$0xff]  ;;  %v151_v48 = vld [vmem:[#allocation5 + $0xf0] sm:$0xff] }
  0x31   :  { %384 = vmatprep.subr.bf16.mxu1 %v486_v0  ;;  %v376_v43 = vpack.c.bf16 %v57_v41, %v56_v40  ;;  %v41_v44 = vld [vmem:[#allocation2] sm:$0xff]  ;;  %v397_v47 = vpack.c.bf16 %v150_v46, %v149_v45 }
  0x32   :  { %362 = vmatpush3.bf16.msra.mxu0 %v361_v14  ;;  %v152_v49 = vld [vmem:[#allocation5 + $0xf8] sm:$0xff] }
  0x33   :  { %363 = vmatprep.subr.bf16.mxu0 %v486_v0  ;;  %v400_v50 = vpack.c.bf16 %v152_v49, %v151_v48  ;;  %v248_v52 = vld [vmem:[%s577_s2] ss:$0 sm:$0xff]  ;;  %v249_v58 = vld [vmem:[%s577_s2 + $0x1] ss:$0 sm:$0xff] }
  0x34   :  { %386 = vmatpush3.bf16.msra.mxu1 %v385_v24 }
  0x35   :  { %387 = vmatprep.subr.bf16.mxu1 %v486_v0 }
  0x36   :  { %365 = vmatpush3.bf16.msra.mxu0 %v364_v21 }
  0x37   :  { %366 = vmatprep.subr.bf16.mxu0 %v486_v0 }
  0x38   :  { %389 = vmatpush3.bf16.msra.mxu1 %v388_v30 }
  0x39   :  { %390 = vmatprep.subr.bf16.mxu1 %v486_v0 }
  0x3a   :  { %368 = vmatpush3.bf16.msra.mxu0 %v367_v27 }
  0x3b   :  { %369 = vmatprep.subr.bf16.mxu0 %v486_v0 }
  0x3c   :  { %392 = vmatpush3.bf16.msra.mxu1 %v391_v36 }
  0x3d   :  { %393 = vmatprep.subr.bf16.mxu1 %v486_v0 }
  0x3e   :  { %371 = vmatpush3.bf16.msra.mxu0 %v370_v33 }
  0x3f   :  { %372 = vmatprep.subr.bf16.mxu0 %v486_v0 }
  0x40   :  { %395 = vmatpush3.bf16.msra.mxu1 %v394_v42 }
  0x41   :  { %396 = vmatprep.subr.bf16.mxu1 %v486_v0 }
  0x42   :  { %374 = vmatpush3.bf16.msra.mxu0 %v373_v39 }
  0x43   :  { %375 = vmatprep.subr.bf16.mxu0 %v486_v0 }
  0x44   :  { %398 = vmatpush3.bf16.msra.mxu1 %v397_v47 }
  0x45   :  { %399 = vmatprep.subr.bf16.mxu1 %v486_v0 }
  0x46   :  { %377 = vmatpush3.bf16.msra.mxu0 %v376_v43 }
  0x48   :  { %401 = vmatpush3.bf16.msra.mxu1 %v400_v50 }
  0x49   :  { %317 = vmatmul.mubr.f32.vlgmr.msra.gmra.mrb[0].mxu0 %v41_v44 }
 0x11c   :  { %v124_v51 = vpop.f32.mrb[0].mxu0 }
 0x11d   :  { %v128_v53 = vmul.f32 %v124_v51, %v41_v44  ;;  %v318_v54 = vpop.f32.mrb[1].mxu0 }
 0x11f   :  { %v134_v55 = vadd.f32 %v248_v52, %v128_v53 }
 0x121   :  { %v135_v56 = vadd.f32 %v134_v55, %v41_v44 }
 0x123   :  { %352 = vmatmul.mubr.f32.vlgmr.msra.gmra.mrb[0].mxu1 %v135_v56 }
 0x1f6   :  { %v219_v57 = vpop.f32.mrb[0].mxu1 }
 0x1f7   :  { %v223_v59 = vmul.f32 %v219_v57, %v41_v44  ;;  %v353_v60 = vpop.f32.mrb[1].mxu1 }
 0x1f9   :  { %v229_v61 = vadd.f32 %v249_v58, %v223_v59 }
 0x1fb   :  { %v230_v62 = vadd.f32 %v229_v61, %v135_v56 }
 0x1fd   :  { %231 = vst [vmem:[#allocation7] sm:$0xff] %v230_v62 }
 0x1fe   :  { %465 = shalt.err (!%p462_p6)
}
 0x1ff   :  { %s466_s18 = scalar_lea.hbm %s578_s3, 128 }
 0x200   :  { %p467_p7 = scmp.ne.s32.totalorder %s578_s3, %s466_s18  ;;  %p470_p8 = scmp.lt.u32.totalorder %s466_s18, %s578_s3 }
 0x202   :  { %p472_p9 = pnand %p470_p8, %p467_p7 }
 0x204   :  { %475 = shalt.err (!%p472_p9)
}
 0x205   :  { %241 = dma.vmem_to_hbm [thread:$0]  %s239_s14, 128, %s578_s3, [#allocation4]  }
 0x206   :  { %480 = dma.done.wait [#allocation4], 128  }
 0x207   :  { %481 = vsyncadd [#allocation4], 4294967168 }
 0x208   :  { %245 = vsyncpa [#allocation3], 1 }
 0x209   :  { %246 = vsyncpa [#allocation6], 1 }
 0x20a   :  { %247 = vsyncpa [#allocation4], 1 }

</bundles_post_ra>
